<compile_context>
chip_gen: v7x
topology: tpu7x:2x2x1
jax: 0.10.0
libtpu: 0.0.40
codegen_flags: <defaults>
</compile_context>

<pallas_src>
import functools

import jax
import jax.numpy as jnp
from jax import lax
from jax.experimental import pallas as pl
from jax.experimental.pallas import tpu as pltpu


def _round_up(v: int, m: int) -> int:
    return ((v + m - 1) // m) * m


def _cdiv(a: int, b: int) -> int:
    return (a + b - 1) // b


def _vmem_capacity_bytes() -> int:
    """Per-core physical VMEM (generation aware), conservative fallback."""
    try:
        info = pltpu.get_tpu_info()
        for name in ("vmem_capacity_bytes", "vmem_bytes", "vmem_size_bytes"):
            v = getattr(info, name, None)
            if isinstance(v, int) and v > 0:
                return v
    except Exception:
        pass
    return 64 << 20  # v7x-sized conservative default


def _const_spec(shape, nbytes):
    """BlockSpec for a constant-index operand.  Double-buffering a constant
    buys nothing, so single-buffer it when it is big enough to matter."""
    idx = lambda i, j: (0,) * len(shape)
    if nbytes >= (512 << 10):
        try:
            return pl.BlockSpec(shape, idx, pipeline_mode=pl.Buffered(1))
        except TypeError:  # older jax without pipeline_mode kwarg
            pass
    return pl.BlockSpec(shape, idx)


def _classifier_kernel(x_ref, w_ref, b_ref, o_ref, acc_ref, *, hw, thw, mask_tail):
    """Grid = (N tiles [parallel], HW tiles [arbitrary / reduction, last]).

    x_ref  : (tn, C, thw)   activation tile (one spatial slice)
    w_ref  : (C, Kp)        weight, pre-transposed, pre-scaled by 1/(H*W), K padded
    b_ref  : (1, Kp) f32    bias, K padded
    o_ref  : (1, tn, Kp)    output tile (resident across the reduction axis)
    acc_ref: (tn, C) f32    VMEM partial-sum accumulator
    """
    j = pl.program_id(1)

    @pl.when(j == 0)
    def _init():
        acc_ref[...] = jnp.zeros_like(acc_ref)

    x = x_ref[...].astype(jnp.float32)                 # (tn, C, thw)
    if mask_tail:
        # Ragged spatial tail: contents past HW are undefined -> zero them.
        remaining = hw - j * thw
        lane = lax.broadcasted_iota(jnp.int32, x.shape, dimension=2)
        x = jnp.where(lane < remaining, x, 0.0)

    # Partial spatial sum for this HW slice (f32 accumulation).  The 1/(H*W)
    # average scale is folded into the weight in the wrapper.
    acc_ref[...] += jnp.sum(x, axis=-1)

    @pl.when(j == pl.num_programs(1) - 1)
    def _finalize():
        pooled = acc_ref[...].astype(w_ref.dtype)      # (tn, C)
        y = jnp.dot(pooled, w_ref[...],
                    preferred_element_type=jnp.float32)  # (tn, Kp) f32
        o_ref[0, :, :] = (y + b_ref[...]).astype(o_ref.dtype)


def prepare_classifier_params(weight, bias, hw, param_dtype=jnp.float32):
    """Hoistable / cacheable per-model prep: fold the avg-pool 1/(H*W) scale
    into the transposed weight and pad the class dim to a lane-dense multiple
    of 128 (zero columns, sliced off after the kernel).

    param_dtype=jnp.bfloat16 halves weight VMEM/HBM on v6e/v7x (accumulation
    stays f32 via preferred_element_type); expect ~1e-2 rel. tolerance then.
    """
    K, C = weight.shape
    Kp = _round_up(max(K, 1), 128)
    w_t = (weight.T.astype(jnp.float32) * (1.0 / hw)).astype(param_dtype)
    w_t = jnp.pad(w_t, ((0, 0), (0, Kp - K)))                       # (C, Kp)
    b2 = jnp.pad(bias.astype(jnp.float32).reshape(1, K),
                 ((0, 0), (0, Kp - K)))                             # (1, Kp)
    return w_t, b2


def classifier_forward(x, weight, bias, *, tn=None, thw=None,
                       param_dtype=jnp.float32):
    """x: (N, C, H, W); weight: (K, C); bias: (K,).  Returns (N, K)."""
    N, C, H, W = x.shape
    K = weight.shape[0]
    HW = H * W
    itemsize = jnp.dtype(x.dtype).itemsize
    out_itemsize = itemsize

    w_t, b2 = prepare_classifier_params(weight, bias, HW, param_dtype)
    Kp = w_t.shape[1]
    w_itemsize = jnp.dtype(w_t.dtype).itemsize

    # ---- batch tile -----------------------------------------------------------
    if tn is None:
        if N <= 1:
            tn = max(1, N)
        elif N <= 16 and N % 2 == 0:
            tn = N // 2          # two parallel blocks -> both v7x TensorCores busy
        elif N <= 16:
            tn = N               # small odd batch: single, non-ragged block
        else:
            tn = 64              # large batch: fat MXU tiles, many parallel blocks
    tn = max(1, min(tn, N))

    # ---- generation-aware VMEM budget ----------------------------------------
    vmem_limit = min((_vmem_capacity_bytes() * 3) // 4, 96 << 20)

    def fixed_bytes(tn_):
        return (C * Kp * w_itemsize              # weight (single-buffered)
                + Kp * 4                         # bias
                + 2 * tn_ * Kp * out_itemsize    # output (double-buffered)
                + tn_ * C * 4                    # accumulator scratch
                + (2 << 20))                     # misc headroom

    def pick_thw(tn_):
        x_buf_budget = max(1 << 20, (vmem_limit - fixed_bytes(tn_)) // 2)
        max_elems = x_buf_budget // max(1, tn_ * C * itemsize)
        if HW <= 128 or HW <= max_elems:
            return HW            # full spatial dim: exempt from 128 rule, 1 step
        return max(128, (min(HW, max_elems) // 128) * 128)

    if thw is None:
        # Target >=512 (f32) / >=1024 (bf16) lanes per step so the cross-lane
        # reduce amortizes against DMA; shrink tn (down to 8) if needed.
        target = min(HW, 512 if itemsize >= 4 else 1024)
        while True:
            thw = pick_thw(tn)
            if thw >= target or tn <= 8:
                break
            tn = max(8, tn // 2)
    else:
        thw = HW if (thw >= HW or HW <= 128) else max(128, (thw // 128) * 128)

    grid_n = _cdiv(N, tn)
    grid_hw = _cdiv(HW, thw)
    mask_tail = (HW % thw) != 0

    # No jnp.pad of the activations: ragged spatial tails are masked in-kernel;
    # ragged batch tails produce garbage rows that are sliced off below (output
    # writes stay in-bounds thanks to the (grid_n, tn, Kp) output layout).
    x3 = x.reshape(N, C, HW)

    x_blk = tn * C * thw * itemsize
    vmem_bytes = int(min(vmem_limit,
                         max(8 << 20, fixed_bytes(tn) + 2 * x_blk + (2 << 20))))

    cost = pl.CostEstimate(
        flops=2 * N * C * Kp + N * C * HW,
        transcendentals=0,
        bytes_accessed=(N * C * HW * itemsize + C * Kp * w_itemsize + Kp * 4
                        + N * Kp * out_itemsize))

    kernel = functools.partial(_classifier_kernel, hw=HW, thw=thw,
                               mask_tail=mask_tail)

    out = pl.pallas_call(
        kernel,
        out_shape=jax.ShapeDtypeStruct((grid_n, tn, Kp), x.dtype),
        grid=(grid_n, grid_hw),
        in_specs=[
            pl.BlockSpec((tn, C, thw), lambda i, j: (i, 0, j)),
            _const_spec((C, Kp), C * Kp * w_itemsize),
            _const_spec((1, Kp), Kp * 4),
        ],
        out_specs=pl.BlockSpec((1, tn, Kp), lambda i, j: (i, 0, 0)),
        scratch_shapes=[pltpu.VMEM((tn, C), jnp.float32)],
        compiler_params=pltpu.CompilerParams(
            dimension_semantics=("parallel", "arbitrary"),
            vmem_limit_bytes=vmem_bytes),
        cost_estimate=cost,
    )(x3, w_t, b2)

    return out.reshape(grid_n * tn, Kp)[:N, :K]


if __name__ == "__main__":
    key = jax.random.PRNGKey(0)
    kx, kw, kb, kx2 = jax.random.split(key, 4)

    N, C = 2, 4
    num_classes = 2

    # Deterministic init mimicking nn.Linear default: U(-1/sqrt(C), 1/sqrt(C)).
    bound = 1.0 / (C ** 0.5)
    weight = jax.random.uniform(kw, (num_classes, C), dtype=jnp.float32,
                                minval=-bound, maxval=bound)
    bias = jax.random.uniform(kb, (num_classes,), dtype=jnp.float32,
                              minval=-bound, maxval=bound)

    # Case 1: H=W=16 (HW=256) with default auto-tiling -> full-HW block,
    # single reduction step, two parallel batch blocks, no padding anywhere.
    x1 = jax.random.normal(kx, (N, C, 16, 16), dtype=jnp.float32)
    out1 = jax.block_until_ready(classifier_forward(x1, weight, bias))
    ref1 = jnp.mean(x1, axis=(2, 3)) @ weight.T + bias
    assert out1.shape == (N, num_classes)
    assert jnp.allclose(out1, ref1, atol=1e-5, rtol=1e-5)

    # Case 2: H=W=13 (HW=169) with thw forced to 128 -> multi-step reduction
    # with a ragged tail tile, exercising the in-kernel mask (no jnp.pad).
    x2 = jax.random.normal(kx2, (N, C, 13, 13), dtype=jnp.float32)
    out2 = jax.block_until_ready(classifier_forward(x2, weight, bias, thw=128))
    ref2 = jnp.mean(x2, axis=(2, 3)) @ weight.T + bias
    assert out2.shape == (N, num_classes)
    assert jnp.allclose(out2, ref2, atol=1e-5, rtol=1e-5)

    print("KERNEL_OK")
</pallas_src>

<mosaic_0001>
module attributes {stable_mosaic.version = 11 : i64} {
  func.func @_classifier_kernel(%arg0: i32, %arg1: i32, %arg2: memref<1x4x256xf32, #tpu.memory_space<vmem>>, %arg3: memref<4x128xf32, #tpu.memory_space<vmem>>, %arg4: memref<1x128xf32, #tpu.memory_space<vmem>>, %arg5: memref<1x1x128xf32, #tpu.memory_space<vmem>>, %arg6: memref<1x4xf32, #tpu.memory_space<vmem>>) attributes {dimension_semantics = [#tpu.dimension_semantics<parallel>, #tpu.dimension_semantics<arbitrary>], iteration_bounds = array<i64: 2, 1>, scalar_prefetch = 0 : i64, scratch_operands = 1 : i64, tpu.core_type = #tpu.core_type<tc>, window_params = [{transform_indices = @transform_0, window_bounds = array<i64: 1, 4, 256>}, {pipeline_mode = #tpu.pipeline_mode<synchronous>, transform_indices = @transform_1, window_bounds = array<i64: 4, 128>}, {pipeline_mode = #tpu.pipeline_mode<synchronous>, transform_indices = @transform_2, window_bounds = array<i64: 1, 128>}, {transform_indices = @transform_3, window_bounds = array<i64: 1, 1, 128>}]} {
    %c0_i32 = arith.constant 0 : i32
    %0 = arith.cmpi eq, %arg1, %c0_i32 : i32
    %1 = arith.extui %0 : i1 to i32
    %c0_i32_0 = arith.constant 0 : i32
    %2 = arith.cmpi ne, %1, %c0_i32_0 : i32
    scf.if %2 {
      %cst_9 = arith.constant 0.000000e+00 : f32
      %11 = vector.broadcast %cst_9 : f32 to vector<1x4xf32>
      %c0_10 = arith.constant 0 : index
      %c0_11 = arith.constant 0 : index
      %12 = vector.load %arg6[%c0_10, %c0_11] : memref<1x4xf32, #tpu.memory_space<vmem>>, vector<1x4xf32>
      tpu.vector_store %arg6[%c0_10, %c0_11], %11 {strides = array<i32>} : memref<1x4xf32, #tpu.memory_space<vmem>>, vector<1x4xf32>,
    } else {
    }
    %c0 = arith.constant 0 : index
    %c0_1 = arith.constant 0 : index
    %c0_2 = arith.constant 0 : index
    %3 = vector.load %arg2[%c0, %c0_1, %c0_2] : memref<1x4x256xf32, #tpu.memory_space<vmem>>, vector<1x4x256xf32>
    %c0_3 = arith.constant 0 : index
    %c0_4 = arith.constant 0 : index
    %4 = vector.load %arg6[%c0_3, %c0_4] : memref<1x4xf32, #tpu.memory_space<vmem>>, vector<1x4xf32>
    %cst = arith.constant dense<0.000000e+00> : vector<1x4xf32>
    %5 = vector.multi_reduction <add>, %3, %cst [2] : vector<1x4x256xf32> to vector<1x4xf32>
    %6 = arith.addf %4, %5 : vector<1x4xf32>
    %c0_5 = arith.constant 0 : index
    %c0_6 = arith.constant 0 : index
    %7 = vector.load %arg6[%c0_5, %c0_6] : memref<1x4xf32, #tpu.memory_space<vmem>>, vector<1x4xf32>
    tpu.vector_store %arg6[%c0_5, %c0_6], %6 {strides = array<i32>} : memref<1x4xf32, #tpu.memory_space<vmem>>, vector<1x4xf32>,
    %c0_i32_7 = arith.constant 0 : i32
    %8 = arith.cmpi eq, %arg1, %c0_i32_7 : i32
    %9 = arith.extui %8 : i1 to i32
    %c0_i32_8 = arith.constant 0 : i32
    %10 = arith.cmpi ne, %9, %c0_i32_8 : i32
    scf.if %10 {
      %c0_9 = arith.constant 0 : index
      %c0_10 = arith.constant 0 : index
      %11 = vector.load %arg6[%c0_9, %c0_10] : memref<1x4xf32, #tpu.memory_space<vmem>>, vector<1x4xf32>
      %c0_11 = arith.constant 0 : index
      %c0_12 = arith.constant 0 : index
      %12 = vector.load %arg3[%c0_11, %c0_12] : memref<4x128xf32, #tpu.memory_space<vmem>>, vector<4x128xf32>
      %cst_13 = arith.constant dense<0.000000e+00> : vector<1x128xf32>
      %13 = tpu.matmul %11, %12, %cst_13 {dimension_numbers = #tpu.dot_dimension_numbers<[1], [0], [0], [1], [0, 0, 1, 1], [], []>} : vector<1x4xf32>, vector<4x128xf32>, vector<1x128xf32> -> vector<1x128xf32>
      %c0_14 = arith.constant 0 : index
      %c0_15 = arith.constant 0 : index
      %14 = vector.load %arg4[%c0_14, %c0_15] : memref<1x128xf32, #tpu.memory_space<vmem>>, vector<1x128xf32>
      %15 = arith.addf %13, %14 : vector<1x128xf32>
      %c0_16 = arith.constant 0 : index
      %c0_17 = arith.constant 0 : index
      %c0_18 = arith.constant 0 : index
      %16 = vector.load %arg5[%c0_16, %c0_17, %c0_18] : memref<1x1x128xf32, #tpu.memory_space<vmem>>, vector<1x1x128xf32>
      %17 = vector.shape_cast %16 : vector<1x1x128xf32> to vector<1x128xf32>
      %18 = vector.shape_cast %15 : vector<1x128xf32> to vector<1x1x128xf32>
      tpu.vector_store %arg5[%c0_16, %c0_17, %c0_18], %18 {strides = array<i32>} : memref<1x1x128xf32, #tpu.memory_space<vmem>>, vector<1x1x128xf32>,
    } else {
    }
    return
  }
  func.func @transform_0(%arg0: i32, %arg1: i32) -> (i32, i32, i32) {
    %c0_i32 = arith.constant 0 : i32
    %c0_i32_0 = arith.constant 0 : i32
    return %arg0, %c0_i32, %arg1 : i32, i32, i32
  }
  func.func @transform_1(%arg0: i32, %arg1: i32) -> (i32, i32) {
    %c0_i32 = arith.constant 0 : i32
    %c0_i32_0 = arith.constant 0 : i32
    %c0_i32_1 = arith.constant 0 : i32
    return %c0_i32, %c0_i32_0 : i32, i32
  }
  func.func @transform_2(%arg0: i32, %arg1: i32) -> (i32, i32) {
    %c0_i32 = arith.constant 0 : i32
    %c0_i32_0 = arith.constant 0 : i32
    %c0_i32_1 = arith.constant 0 : i32
    return %c0_i32, %c0_i32_0 : i32, i32
  }
  func.func @transform_3(%arg0: i32, %arg1: i32) -> (i32, i32, i32) {
    %c0_i32 = arith.constant 0 : i32
    %c0_i32_0 = arith.constant 0 : i32
    %c0_i32_1 = arith.constant 0 : i32
    return %arg0, %c0_i32, %c0_i32_0 : i32, i32, i32
  }
}

</mosaic_0001>

<bundles_post_ra>
// kernel: tpu_custom_call.1
= control target key start
LH: loop header
LB: loop body
LE: loop exit
PB: predicated region body
PF: predicated region fallthrough
CT: control target
= control target key end

     0   :  { %8 = vsyncpa [#allocation4], 0  ;;  %s986_s0 = inlined_call_operand.hbm [shape: f32[2,4,256], index: 0, kind: input, shape index: {}]   ;;  %s987_s1 = inlined_call_operand.hbm [shape: f32[4,128], index: 1, kind: input, shape index: {}]   ;;  %s988_s2 = inlined_call_operand.vmem [shape: f32[1,128], index: 2, kind: input, shape index: {}]   ;;  %s989_s3 = inlined_call_operand.hbm [shape: f32[2,1,128], index: 3, kind: output, shape index: {}]  }
   0x1   :  { %10 = vsyncpa [#allocation4 + $0x1], 0 }
   0x2   :  { %11 = vsyncpa [#allocation7], 0 }
   0x3   :  { %12 = vsyncpa [#allocation5], 0 }
   0x4   :  { %14 = vsyncpa [#allocation5 + $0x1], 0  ;;  %s761_s12 = smov 0   ;;  %s763_s13 = smov 0  }
   0x5   :  { %s765_s14 = smov 0   ;;  %s767_s15 = smov 0  }
   0x6   :  { %s769_s16 = smov 0   ;;  %s771_s17 = smov 0  }
   0x7 LB: > { %s485_s18 = sadd.s32 4294967295, %s732_s17   ;;  %s486_s19 = sadd.s32 4294967294, %s732_s17   ;;  %s732_s17 = sphi %s771_s17, %s20_s17   ;;  %s728_s16 = sphi %s769_s16, %s1014_s16   ;;  %s724_s15 = sphi %s767_s15, %s1013_s15   ;;  %s720_s14 = sphi %s765_s14, %s1012_s14   ;;  %s716_s13 = sphi %s763_s13, %s1011_s13   ;;  %s712_s12 = sphi %s761_s12, %s1010_s12  }
   0x8   : > { %p54_p0 = scmp.ne.s32.totalorder %s716_s13, %s712_s12  ;;  %p795_p1 = scmp.eq.s32.totalorder %s485_s18, 0 }
   0x9   : > { %p799_p2 = scmp.eq.s32.totalorder %s485_s18, 1  ;;  %p126_p3 = scmp.eq.s32.totalorder %s486_s19, 1 }
   0xa   : > { %s994_s20 = scalar_select %p795_p1, 1, 0 }
   0xb   : > { %s995_s21 = scalar_select %p799_p2, 1, 0 }
   0xc   : > { %p805_p4 = por %p795_p1, %p54_p0  ;;  %p487_p5 = scmp.ge.s32.totalorder %s732_s17, 1 }
   0xd   : > { %p810_p6 = por %p126_p3, %p54_p0  ;;  %p133_p7 = scmp.lt.s32.totalorder %s732_s17, 3 }
   0xe   : > { %s996_s22 = scalar_select %p805_p4, 1, 0 }
   0xf   : > { %s997_s23 = scalar_select %p810_p6, 1, 0 }
  0x10   : > { %p815_p8 = pnand %p487_p5, %p133_p7  ;;  %s734_s25 = smov [#allocation6]  }
  0x11   : > { %s146_s26 = sshll.u32 %s734_s25, 4  ;;  %s32_s28 = sadd.s32 1, %s728_s16  ;;  %s147_s26 = int_to_ptr.vmem [resolvable:$true] %s146_s26 }
  0x12   : > { %s998_s24 = scalar_select %p815_p8, 1, 0 }
  0x13   : > { %p517_p10 = pneg %p815_p8  ;;  %s41_s29 = sadd.s32 1, %s720_s14 }
  0x14   : > { %p830_p12 = scmp.ge.s32.totalorder %s32_s28, 2  ;;  %s588_s6 = scalar_lea.hbm %s987_s1, 64 }
  0x15   : > { %p824_p11 = pnand %p517_p10, %p795_p1  ;;  %p589_p13 = scmp.ne.s32.totalorder %s987_s1, %s588_s6 }
  0x16   : > { %s1000_s30 = scalar_select %p830_p12, 1, 0 }
  0x17   : > { %p590_p0 = pneg %p824_p11  ;;  %p595_p7 = scmp.lt.u32.totalorder %s588_s6, %s987_s1 }
  0x19   : > { %p591_p3 = pnand %p590_p0, %p589_p13 }
  0x1b   : > { %p592_p5 = pneg %p591_p3 }
  0x1d   : > { %p597_p10 = pnand %p595_p7, %p592_p5 }
  0x1f   : > { %600 = shalt.err (!%p597_p10)
}
  0x20   : > { %s601_s11 = scalar_lea.vmem %s147_s26, 64  ;;  %p609_p4 = scmp.lt.s32.totalorder %s147_s26, %s147_s26 }
  0x21   : > { %p602_p9 = scmp.ne.s32.totalorder %s147_s26, %s601_s11  ;;  %p610_p8 = scmp.lt.s32.totalorder %s601_s11, %s601_s11 }
  0x23   : > { %p604_p6 = pnand %p602_p9, %p590_p0  ;;  %p611_p2 = por %p610_p8, %p609_p4 }
  0x25   : > { %p605_p1 = pneg %p604_p6 }
  0x27   : > { %p612_p12 = pnand %p611_p2, %p605_p1 }
  0x29   : > { %615 = shalt.err (!%p612_p12)
}
  0x2a   : > { %520 = dma.hbm_to_vmem [thread:$0]  (!%p824_p11), %s987_s1, 64, %s147_s26, [#allocation7]  }
  0x2b   : > { %p1001_p4 = scmp.ne.s32.totalorder %s1000_s30, 0  ;;  %p48_p1 = scmp.ne.s32.totalorder %s720_s14, %s716_s13 }
  0x2c   : > { %p49_p2 = scmp.eq.s32.totalorder %s732_s17, 0  ;;  %p530_p6 = scmp.lt.s32.totalorder %s732_s17, 2 }
  0x2d   : > { %s1016_s28 = smov (%p1001_p4, %s32_s28), 0  ;;  %p1002_p12 = scmp.ne.s32.totalorder %s995_s21, 0 }
  0x2e   : > { %s36_s25 = ssub.s32 %s728_s16, %s1016_s28  ;;  %p50_p9 = por %p49_p2, %p48_p1 }
  0x2f   : > { %p39_p8 = scmp.eq.s32.totalorder %s36_s25, 0  ;;  %p862_p13 = por %p1002_p12, %p48_p1 }
  0x30   : > { %s160_s4 = sand.u32 1, %s720_s14   ;;  %s501_s30 = sshll.u32 %s728_s16, 7 }
  0x31   : > { %s870_s5 = scalar_select %p39_p8, %s720_s14, %s41_s29  }
  0x32   : > { %s490_s26 = sshll.u32 %s160_s4, 3  ;;  %s876_s8 = scalar_lea.hbm %s986_s0, %s501_s30 }
  0x33   : > { %s164_s21 = scalar_lea.vmem [#allocation3], %s490_s26  ;;  %p880_p11 = pnand %p530_p6, %p50_p9 }
  0x34   : > { %s174_s9 = sshll.u32 %s164_s21, 4  ;;  %s161_s29 = scalar_lea.sflag [#allocation4], %s160_s4  ;;  %s878_s9 = int_to_ptr.vmem [resolvable:$true] %s174_s9 }
  0x35   : > { %s616_s11 = scalar_lea.hbm %s876_s8, 128  ;;  %p618_p3 = pneg %p880_p11 }
  0x36   : > { %p617_p0 = scmp.ne.s32.totalorder %s876_s8, %s616_s11  ;;  %s621_s25 = scalar_lea.hbm %s986_s0, 256 }
  0x37   : > { %p622_p10 = scmp.lt.u32.totalorder %s876_s8, %s986_s0  ;;  %p623_p4 = scmp.lt.u32.totalorder %s621_s25, %s616_s11 }
  0x38   : > { %p619_p5 = pnand %p618_p3, %p617_p0  ;;  %p625_p2 = scmp.lt.u32.totalorder %s616_s11, %s876_s8 }
  0x39   : > { %p624_p1 = por %p623_p4, %p622_p10 }
  0x3a   : > { %p620_p7 = pneg %p619_p5 }
  0x3b   : > { %p626_p6 = por %p625_p2, %p624_p1 }
  0x3d   : > { %p627_p8 = pnand %p626_p6, %p620_p7 }
  0x3f   : > { %630 = shalt.err (!%p627_p8)
}
  0x40   : > { %s631_s4 = scalar_lea.vmem %s878_s9, 128  ;;  %s735_s6 = smov [#allocation3]  }
  0x41   : > { %p632_p9 = scmp.ne.s32.totalorder %s878_s9, %s631_s4  ;;  %s636_s7 = sshll.u32 %s735_s6, 4  ;;  %s637_s7 = int_to_ptr.vmem [resolvable:$false] %s636_s7 }
  0x42   : > { %s638_s21 = scalar_lea.vmem %s637_s7, 256  ;;  %p639_p5 = scmp.lt.s32.totalorder %s878_s9, %s637_s7 }
  0x43   : > { %p634_p12 = pnand %p632_p9, %p618_p3  ;;  %p640_p10 = scmp.lt.s32.totalorder %s638_s21, %s631_s4 }
  0x45   : > { %p635_p0 = pneg %p634_p12  ;;  %p641_p4 = por %p640_p10, %p639_p5 }
  0x47   : > { %p642_p1 = pnand %p641_p4, %p635_p0 }
  0x49   : > { %645 = shalt.err (!%p642_p1)
}
  0x4a   : > { %524 = dma.hbm_to_vmem [thread:$0]  (!%p880_p11), %s876_s8, 128, %s878_s9, %s161_s29  }
  0x4b   : > { %p1005_p7 = scmp.ne.s32.totalorder %s998_s24, 0 }
  0x4c   : > { %s912_s11 = sand.u32 (!%p1005_p7), 1, %s716_s13   ;;  %p1006_p3 = scmp.ne.s32.totalorder (!%p1005_p7), %s996_s22, 0 }
  0x4d   : > { %183 = sbr.rel (%p1005_p7) target bundleno = 618 (0x26a), region = 32  ;;  %s494_s18 = sshll.u32 (!%p1005_p7), %s912_s11, 3 }
  0x4e   : > { %s186_s19 = scalar_lea.sflag (!%p1005_p7), [#allocation4], %s912_s11  ;;  %s189_s25 = scalar_lea.vmem (!%p1005_p7), [#allocation3], %s494_s18 }
  0x54   : > { %699 = dma.done.wait (%p1006_p3), %s186_s19, 128  }
  0x55   : > { %701 = vsyncadd (%p1006_p3), %s186_s19, 4294967168  ;;  %p1007_p2 = scmp.ne.s32.totalorder %s994_s20, 0 }
  0x57   : > { %703 = dma.done.wait (%p1007_p2), [#allocation7], 64  }
  0x58   : > { %705 = vsyncadd (%p1007_p2), [#allocation7], 4294967232  ;;  %vm227_vm0 = vcmask 1043456   ;;  %v222_v0 = vld [vmem:[%s189_s25] sm:$0xff]  ;;  %v736_v5 = vmov 0   ;;  %v234_v6 = vlaneseq  ;;  %vm220_vm1 = vcmask 24576  }
  0x59   : > { %v225_v1 = vcombine.high %v222_v0, %v222_v0  ;;  %v228_v2 = vsel %vm227_vm0, %v222_v0, 0.0  ;;  %586 = vset.pattern.permute.xlu0 %v736_v5  ;;  %v737_v10 = vmov 1966171168   ;;  %v738_v29 = vmov 0.0   ;;  %v305_v30 = vld [vmem:[#allocation6] sm:$0xf] }
  0x5a   : > { %v235_v7 = vshrl.u32 %v234_v6, 7  ;;  %v278_v8 = vand.u32 127, %v234_v6  ;;  %v253_v11 = vunpack.c.l.s4 %v737_v10  ;;  %221 = vst.msk [vmem:[#allocation2] sm:$0x1] %vm220_vm1, %v738_v29  ;;  %504 = vmatprep.subr.mxu0 %v738_v29  ;;  %vm739_vm2 = vmmov 0   ;;  %s498_s24 = sshll.u32 %s724_s15, 4 }
  0x5b   : > { %v229_v3 = vsel %vm227_vm0, %v225_v1, 0.0  ;;  %505 = vmatpush3.msk.msra.mxu0 %vm227_vm0, %v305_v30  ;;  %506 = vmatprep.mubr.msk.f32.mxu0 %vm739_vm2, %v738_v29  ;;  %vm307_vm3 = vcmask 31744   ;;  %v306_v38 = vld [vmem:[%s988_s2] sm:$0x1]  ;;  %s214_s8 = scalar_lea.vmem [#allocation8], %s912_s11  ;;  %s937_s26 = scalar_lea.hbm %s989_s3, %s498_s24 }
  0x5c   : > { %v230_v4 = vadd.f32 %v229_v3, %v228_v2  ;;  %v281_v9 = vsub.s32 %v278_v8, %v235_v7  ;;  %v254_v12 = vunpack.c.0.s8 %v253_v11  ;;  %v236_v13 = vsub.s32 0, %v235_v7  ;;  %s398_s9 = sshll.u32 %s214_s8, 4  ;;  %s386_s30 = scalar_lea.sflag [#allocation5], %s912_s11  ;;  %s939_s9 = int_to_ptr.vmem [resolvable:$true] %s398_s9 }
  0x5d   : > { %v240_v14 = vsub.s32 1, %v235_v7  ;;  %v244_v15 = vsub.s32 2, %v235_v7  ;;  %v248_v16 = vsub.s32 3, %v235_v7  ;;  %s646_s4 = scalar_lea.vmem %s939_s9, 16  ;;  %s740_s15 = smov [#allocation8]  }
  0x5e   : > { %231 = vadd.xlane.f32.xlu0 %v230_v4  ;;  %v257_v18 = vsub.s32 %v254_v12, %v235_v7  ;;  %p647_p11 = scmp.ne.s32.totalorder %s939_s9, %s646_s4  ;;  %s650_s6 = sshll.u32 %s740_s15, 4  ;;  %s651_s6 = int_to_ptr.vmem [resolvable:$false] %s650_s6 }
  0x5f   : > { %s652_s7 = scalar_lea.vmem %s651_s6, 32  ;;  %p653_p9 = scmp.lt.s32.totalorder %s939_s9, %s651_s6 }
  0x60   : > { %p648_p6 = pnand %p647_p11, %p862_p13  ;;  %p654_p12 = scmp.lt.s32.totalorder %s652_s7, %s646_s4 }
  0x61   : > { %v223_v34 = vld [vmem:[#allocation2] sm:$0x1] }
  0x62   : > { %p649_p8 = pneg %p648_p6  ;;  %p655_p0 = por %p654_p12, %p653_p9 }
  0x64   : > { %p656_p5 = pnand %p655_p0, %p649_p8 }
  0xeb   : > { %v232_v17 = vpop.xlane.xlu0 %231 }
  0xec   : > { %v237_v19 = vrot.slane %v232_v17, %v236_v13  ;;  %v241_v20 = vrot.slane %v232_v17, %v240_v14  ;;  %v245_v21 = vrot.slane %v232_v17, %v244_v15  ;;  %v249_v22 = vrot.slane %v232_v17, %v248_v16 }
  0xee   : > { %v250_v23 = vcombine.low %v237_v19, %v241_v20  ;;  %v251_v24 = vcombine.low %v245_v21, %v249_v22 }
  0xf0   : > { %v258_v25 = vrot.slane %v250_v23, %v257_v18  ;;  %v265_v26 = vrot.slane %v251_v24, %v257_v18 }
  0xf2   : > { %v266_v27 = vcombine.low %v258_v25, %v265_v26 }
  0xf4   : > { %v273_v28 = vrot.slane %v266_v27, %v257_v18 }
  0xf6   : > { %275 = vperm.xlu0 %586, %v273_v28  }
 0x175   : > { %v276_v31 = vpop.permute.xlu0 %275 }
 0x176   : > { %v282_v32 = vrot.slane %v276_v31, %v281_v9 }
 0x178   : > { %v289_v33 = vrot.slane %v282_v32, %v257_v18 }
 0x17a   : > { %v296_v35 = vrot.slane %v289_v33, %v257_v18 }
 0x17c   : > { %v298_v36 = vadd.f32 %v296_v35, %v223_v34 }
 0x17e   : > { %300 = vst.msk [vmem:[#allocation2] sm:$0x1] %vm220_vm1, %v298_v36 }
 0x185   : > { %v304_v37 = vld [vmem:[#allocation2] sm:$0x1] }
 0x186   : > { %507 = vmatmul.mubr.msk.f32.vlgmr.msra.gmra.mrb[0].mxu0 %vm307_vm3, %v304_v37 }
 0x259   : > { %v380_v39 = vpop.f32.mrb[0].mxu0 }
 0x25a   : > { %v381_v40 = vadd.f32 %v380_v39, %v306_v38  ;;  %v508_v41 = vpop.f32.mrb[1].mxu0 }
 0x25c   : > { %384 = vst [vmem:[%s214_s8] sm:$0x1] %v381_v40 }
 0x25d   : > { %659 = shalt.err (!%p656_p5)
}
 0x25e   : > { %s660_s21 = scalar_lea.hbm %s937_s26, 16  ;;  %s664_s19 = scalar_lea.hbm %s989_s3, 32 }
 0x25f   : > { %p661_p10 = scmp.ne.s32.totalorder %s937_s26, %s660_s21  ;;  %p665_p7 = scmp.lt.u32.totalorder %s937_s26, %s989_s3 }
 0x260   : > { %p666_p3 = scmp.lt.u32.totalorder %s664_s19, %s660_s21  ;;  %p668_p11 = scmp.lt.u32.totalorder %s660_s21, %s937_s26 }
 0x261   : > { %p662_p4 = pnand %p661_p10, %p862_p13 }
 0x262   : > { %p667_p2 = por %p666_p3, %p665_p7 }
 0x263   : > { %p663_p1 = pneg %p662_p4 }
 0x264   : > { %p669_p6 = por %p668_p11, %p667_p2 }
 0x266   : > { %p670_p8 = pnand %p669_p6, %p663_p1 }
 0x268   : > { %673 = shalt.err (!%p670_p8)
}
 0x269   : > { %515 = dma.vmem_to_hbm [thread:$0]  (%p862_p13), %s939_s9, 16, %s937_s26, %s386_s30  }
 0x26a PF: > { %s410_s22 = sand.u32 1, %s712_s12   ;;  %p1008_p9 = scmp.ne.s32.totalorder %s997_s23, 0 }
 0x26b   : > { %p1009_p12 = scmp.ge.s32.totalorder %s732_s17, 2  ;;  %s411_s24 = scalar_lea.sflag [#allocation5], %s410_s22 }
 0x26d   : > { %p526_p0 = pnand %p1009_p12, %p1008_p9 }
 0x26f   : > { %707 = dma.done.wait (!%p526_p0), %s411_s24, 16  }
 0x270   : > { %709 = vsyncadd (!%p526_p0), %s411_s24, 4294967280  ;;  %s20_s17 = sadd.s32 1, %s732_s17   ;;  %s1010_s12 = smov %s716_s13 }
 0x271   : > { %p17_p5 = scmp.ge.s32.totalorder %s20_s17, 4   ;;  %s1011_s13 = smov %s720_s14 }
 0x272   : > { %s1012_s14 = smov %s870_s5  ;;  %s1013_s15 = smov %s728_s16 }
 0x273   : > { %s1014_s16 = smov %s1016_s28  ;;  %19 = sbr.rel (!%p17_p5) target bundleno = 7 (0x7), region = 89 }
 0x27a   :  { %415 = vsyncpa [#allocation4], 1 }
 0x27b   :  { %417 = vsyncpa [#allocation4 + $0x1], 1 }
 0x27c   :  { %418 = vsyncpa [#allocation7], 1 }
 0x27d   :  { %419 = vsyncpa [#allocation5], 1 }
 0x27e   :  { %421 = vsyncpa [#allocation5 + $0x1], 1 }

</bundles_post_ra>
